<compile_context>
chip_gen: v7x
topology: tpu7x:2x2x1
jax: 0.10.0
libtpu: 0.0.40
codegen_flags: <defaults>
</compile_context>

<pallas_src>
import jax
import jax.numpy as jnp
from jax.experimental import pallas as pl
from jax.experimental.pallas import tpu as pltpu


def _predictor_kernel(cpd_ref, prt_ref, w1_ref, w2_ref, wc_ref, wp_ref, out_ref):
    # Blocks: cpd (TB, Nc, D), prt (TB, Np, D); weights are small broadcast blocks.
    cpd = cpd_ref[...]                     # native dtype; promoted by f32 weights
    prt = prt_ref[...]
    w1 = w1_ref[...]                       # (1, 1, D) f32
    w2 = w2_ref[...]                       # (1, 1, D) f32
    wc = wc_ref[...]                       # (D, n_output) f32 (compound half of ln)
    wp = wp_ref[...]                       # (D, n_output) f32 (protein half of ln)

    # ---- attention scores: relu(<x, w>) kept as (TB, N, 1) so the softmax
    # reduces along the sublane (N) axis and the weights broadcast along the
    # lane (D) axis in the pooling multiply below (no cross-lane transpose).
    s1 = jnp.maximum(jnp.sum(cpd * w1, axis=-1, keepdims=True), 0.0)   # (TB, Nc, 1) f32
    m1 = jnp.max(s1, axis=1, keepdims=True)                            # (TB, 1, 1)
    e1 = jnp.exp(s1 - m1)
    a1 = e1 * pl.reciprocal(jnp.sum(e1, axis=1, keepdims=True), approx=True)

    s2 = jnp.maximum(jnp.sum(prt * w2, axis=-1, keepdims=True), 0.0)   # (TB, Np, 1) f32
    m2 = jnp.max(s2, axis=1, keepdims=True)
    e2 = jnp.exp(s2 - m2)
    a2 = e2 * pl.reciprocal(jnp.sum(e2, axis=1, keepdims=True), approx=True)

    # ---- attention-weighted pooling over the sequence axis (f32 accumulate).
    cf = jnp.sum(cpd * a1, axis=1)                                     # (TB, D) f32
    pf = jnp.sum(prt * a2, axis=1)                                     # (TB, D) f32

    # ---- final linear on concat([cf, pf]) as two MXU dots contracting D.
    out = (jnp.dot(cf, wc, preferred_element_type=jnp.float32)
           + jnp.dot(pf, wp, preferred_element_type=jnp.float32))      # (TB, n_output)
    out_ref[...] = out.astype(out_ref.dtype)


def _vmem_params():
    """(input-block budget, scoped vmem limit) chosen per TPU generation."""
    try:
        vmem_bytes = int(pltpu.get_tpu_info().vmem_capacity_bytes)
    except Exception:
        vmem_bytes = 64 * 1024 * 1024  # conservative fallback (v7x-sized)
    if vmem_bytes >= 96 * 1024 * 1024:
        # v5e / v6e: 128 MiB physical VMEM -> bigger streaming blocks.
        return 16 * 1024 * 1024, 64 * 1024 * 1024
    # v7x: 64 MiB physical per TC -> stay inside the 32 MiB scoped limit.
    return 8 * 1024 * 1024, 32 * 1024 * 1024


def _choose_batch_tile(B, Nc, Np, D, budget):
    """Pick TB so double-buffered blocks + f32 intermediates fit the budget.

    Lane width is budgeted as if D were padded to a multiple of 128.  The 3x
    factor covers: 2x double-buffered DMA block + ~1x f32 broadcast-product
    intermediate per array.  Never inflates TB past the budget; tiled TB is a
    multiple of 8 so the (TB, n_output) output block is layout-legal.
    """
    d_pad = ((D + 127) // 128) * 128
    bytes_per_row = 3 * (Nc + Np) * d_pad * 4
    tb = max(1, budget // bytes_per_row)
    # Give v7x's two TensorCores >= 2 grid steps to shard across when the
    # batch is large enough that a multiple-of-8 tile still splits it.
    half = ((B + 1) // 2 + 7) // 8 * 8          # round_up(ceil(B/2), 8)
    if half < B:
        tb = min(tb, half)
    if tb >= B:
        return B
    return max(8, (tb // 8) * 8)


def predictor_forward(cpd_atom_feats, prt_aa_feats, w1, w2, w_ln):
    """cpd_atom_feats: (B, Nc, D); prt_aa_feats: (B, Np, D)
       w1, w2: (D, 1)            (torch W.weight.T)
       w_ln:   (2*D, n_output)   (torch ln.weight.T)
       returns (B, n_output) float32
    """
    B, Nc, D = cpd_atom_feats.shape
    _, Np, _ = prt_aa_feats.shape
    n_output = w_ln.shape[-1]

    # One-time wrapper-side relayout of the tiny weights into broadcast /
    # dot-friendly layouts (kernel then needs no transposes and no concat).
    w1_b = w1.reshape(1, 1, D).astype(jnp.float32)
    w2_b = w2.reshape(1, 1, D).astype(jnp.float32)
    wc = w_ln[:D, :].astype(jnp.float32)     # (D, n_output)
    wp = w_ln[D:, :].astype(jnp.float32)     # (D, n_output)

    budget, vmem_limit = _vmem_params()
    tb = _choose_batch_tile(B, Nc, Np, D, budget)
    grid = (pl.cdiv(B, tb),)

    out = pl.pallas_call(
        _predictor_kernel,
        out_shape=jax.ShapeDtypeStruct((B, n_output), jnp.float32),
        grid_spec=pltpu.PrefetchScalarGridSpec(
            num_scalar_prefetch=0,
            grid=grid,
            in_specs=[
                pl.BlockSpec((tb, Nc, D), lambda b: (b, 0, 0)),
                pl.BlockSpec((tb, Np, D), lambda b: (b, 0, 0)),
                pl.BlockSpec((1, 1, D), lambda b: (0, 0, 0)),
                pl.BlockSpec((1, 1, D), lambda b: (0, 0, 0)),
                pl.BlockSpec((D, n_output), lambda b: (0, 0)),
                pl.BlockSpec((D, n_output), lambda b: (0, 0)),
            ],
            out_specs=pl.BlockSpec((tb, n_output), lambda b: (b, 0)),
        ),
        compiler_params=pltpu.CompilerParams(
            dimension_semantics=("parallel",),
            vmem_limit_bytes=vmem_limit,
        ),
    )(cpd_atom_feats, prt_aa_feats, w1_b, w2_b, wc, wp)

    return out  # (B, n_output)


def predictor_reference(cpd, prt, w1, w2, w_ln):
    """Pure-JAX reference mirroring the PyTorch Predictor.forward (eval mode)."""
    cpd = cpd.astype(jnp.float32)
    prt = prt.astype(jnp.float32)
    s1 = jax.nn.relu(jnp.einsum("bnd,dk->bnk", cpd, w1))[..., 0]  # (B, Nc)
    a1 = jax.nn.softmax(s1, axis=-1)
    s2 = jax.nn.relu(jnp.einsum("bnd,dk->bnk", prt, w2))[..., 0]  # (B, Np)
    a2 = jax.nn.softmax(s2, axis=-1)
    cf = jnp.sum(cpd * a1[..., None], axis=1)
    pf = jnp.sum(prt * a2[..., None], axis=1)
    cat = jnp.concatenate([cf, pf], axis=-1)
    return cat @ w_ln


if __name__ == "__main__":
    key = jax.random.PRNGKey(0)
    B, Nc, Np, D, n_output = 2, 8, 16, 32, 1

    k1, k2, k3, k4, k5 = jax.random.split(key, 5)
    cpd = jax.random.normal(k1, (B, Nc, D), dtype=jnp.float32)
    prt = jax.random.normal(k2, (B, Np, D), dtype=jnp.float32)
    # Deterministic synthetic parameters (shapes from Predictor.__init__):
    #   W1: Linear(d_model, 1, bias=False)          -> (D, 1) pre-transposed
    #   W2: Linear(d_model, 1, bias=False)          -> (D, 1)
    #   ln: Linear(2*d_model, n_output, bias=False) -> (2D, n_output)
    w1 = jax.random.normal(k3, (D, 1), dtype=jnp.float32) * (1.0 / jnp.sqrt(D))
    w2 = jax.random.normal(k4, (D, 1), dtype=jnp.float32) * (1.0 / jnp.sqrt(D))
    w_ln = jax.random.normal(k5, (2 * D, n_output), dtype=jnp.float32) * (
        1.0 / jnp.sqrt(2 * D))

    out = predictor_forward(cpd, prt, w1, w2, w_ln)
    out = jax.block_until_ready(out)

    ref = predictor_reference(cpd, prt, w1, w2, w_ln)
    assert out.shape == (B, n_output), out.shape
    # Tolerance accounts for the EUP approximate reciprocal in the softmax.
    assert jnp.allclose(out, ref, atol=1e-2, rtol=1e-2), (out, ref)

    print("KERNEL_OK")
</pallas_src>

<mosaic_0001>
module attributes {stable_mosaic.version = 11 : i64} {
  func.func @_predictor_kernel(%arg0: i32, %arg1: memref<2x8x32xf32, #tpu.memory_space<vmem>>, %arg2: memref<2x16x32xf32, #tpu.memory_space<vmem>>, %arg3: memref<1x1x32xf32, #tpu.memory_space<vmem>>, %arg4: memref<1x1x32xf32, #tpu.memory_space<vmem>>, %arg5: memref<32x1xf32, #tpu.memory_space<vmem>>, %arg6: memref<32x1xf32, #tpu.memory_space<vmem>>, %arg7: memref<2x1xf32, #tpu.memory_space<vmem>>) attributes {dimension_semantics = [#tpu.dimension_semantics<parallel>], iteration_bounds = array<i64: 1>, scalar_prefetch = 0 : i64, scratch_operands = 0 : i64, tpu.core_type = #tpu.core_type<tc>, window_params = [{transform_indices = @transform_0, window_bounds = array<i64: 2, 8, 32>}, {transform_indices = @transform_1, window_bounds = array<i64: 2, 16, 32>}, {pipeline_mode = #tpu.pipeline_mode<synchronous>, transform_indices = @transform_2, window_bounds = array<i64: 1, 1, 32>}, {pipeline_mode = #tpu.pipeline_mode<synchronous>, transform_indices = @transform_3, window_bounds = array<i64: 1, 1, 32>}, {pipeline_mode = #tpu.pipeline_mode<synchronous>, transform_indices = @transform_4, window_bounds = array<i64: 32, 1>}, {pipeline_mode = #tpu.pipeline_mode<synchronous>, transform_indices = @transform_5, window_bounds = array<i64: 32, 1>}, {transform_indices = @transform_6, window_bounds = array<i64: 2, 1>}]} {
    %c0 = arith.constant 0 : index
    %c0_0 = arith.constant 0 : index
    %c0_1 = arith.constant 0 : index
    %0 = vector.load %arg1[%c0, %c0_0, %c0_1] : memref<2x8x32xf32, #tpu.memory_space<vmem>>, vector<2x8x32xf32>
    %c0_2 = arith.constant 0 : index
    %c0_3 = arith.constant 0 : index
    %c0_4 = arith.constant 0 : index
    %1 = vector.load %arg2[%c0_2, %c0_3, %c0_4] : memref<2x16x32xf32, #tpu.memory_space<vmem>>, vector<2x16x32xf32>
    %c0_5 = arith.constant 0 : index
    %c0_6 = arith.constant 0 : index
    %c0_7 = arith.constant 0 : index
    %2 = vector.load %arg3[%c0_5, %c0_6, %c0_7] : memref<1x1x32xf32, #tpu.memory_space<vmem>>, vector<1x1x32xf32>
    %c0_8 = arith.constant 0 : index
    %c0_9 = arith.constant 0 : index
    %c0_10 = arith.constant 0 : index
    %3 = vector.load %arg4[%c0_8, %c0_9, %c0_10] : memref<1x1x32xf32, #tpu.memory_space<vmem>>, vector<1x1x32xf32>
    %c0_11 = arith.constant 0 : index
    %c0_12 = arith.constant 0 : index
    %4 = vector.load %arg5[%c0_11, %c0_12] : memref<32x1xf32, #tpu.memory_space<vmem>>, vector<32x1xf32>
    %c0_13 = arith.constant 0 : index
    %c0_14 = arith.constant 0 : index
    %5 = vector.load %arg6[%c0_13, %c0_14] : memref<32x1xf32, #tpu.memory_space<vmem>>, vector<32x1xf32>
    %6 = vector.broadcast %2 : vector<1x1x32xf32> to vector<2x8x32xf32>
    %7 = arith.mulf %0, %6 : vector<2x8x32xf32>
    %cst = arith.constant dense<0.000000e+00> : vector<2x8xf32>
    %8 = vector.multi_reduction <add>, %7, %cst [2] : vector<2x8x32xf32> to vector<2x8xf32>
    %9 = vector.shape_cast %8 : vector<2x8xf32> to vector<2x8x1xf32>
    %cst_15 = arith.constant 0.000000e+00 : f32
    %10 = vector.broadcast %cst_15 : f32 to vector<2x8x1xf32>
    %11 = arith.maximumf %9, %10 : vector<2x8x1xf32>
    %cst_16 = arith.constant dense<0xFF800000> : vector<2x1xf32>
    %12 = vector.multi_reduction <maximumf>, %11, %cst_16 [1] : vector<2x8x1xf32> to vector<2x1xf32>
    %13 = vector.shape_cast %12 : vector<2x1xf32> to vector<2x1x1xf32>
    %14 = vector.broadcast %13 : vector<2x1x1xf32> to vector<2x8x1xf32>
    %15 = arith.subf %11, %14 : vector<2x8x1xf32>
    %16 = math.exp %15 : vector<2x8x1xf32>
    %cst_17 = arith.constant dense<0.000000e+00> : vector<2x1xf32>
    %17 = vector.multi_reduction <add>, %16, %cst_17 [1] : vector<2x8x1xf32> to vector<2x1xf32>
    %18 = vector.shape_cast %17 : vector<2x1xf32> to vector<2x1x1xf32>
    %19 = tpu.reciprocal %18 {approx = true} : vector<2x1x1xf32> -> vector<2x1x1xf32>
    %20 = vector.broadcast %19 : vector<2x1x1xf32> to vector<2x8x1xf32>
    %21 = arith.mulf %16, %20 : vector<2x8x1xf32>
    %22 = vector.broadcast %3 : vector<1x1x32xf32> to vector<2x16x32xf32>
    %23 = arith.mulf %1, %22 : vector<2x16x32xf32>
    %cst_18 = arith.constant dense<0.000000e+00> : vector<2x16xf32>
    %24 = vector.multi_reduction <add>, %23, %cst_18 [2] : vector<2x16x32xf32> to vector<2x16xf32>
    %25 = vector.shape_cast %24 : vector<2x16xf32> to vector<2x16x1xf32>
    %cst_19 = arith.constant 0.000000e+00 : f32
    %26 = vector.broadcast %cst_19 : f32 to vector<2x16x1xf32>
    %27 = arith.maximumf %25, %26 : vector<2x16x1xf32>
    %cst_20 = arith.constant dense<0xFF800000> : vector<2x1xf32>
    %28 = vector.multi_reduction <maximumf>, %27, %cst_20 [1] : vector<2x16x1xf32> to vector<2x1xf32>
    %29 = vector.shape_cast %28 : vector<2x1xf32> to vector<2x1x1xf32>
    %30 = vector.broadcast %29 : vector<2x1x1xf32> to vector<2x16x1xf32>
    %31 = arith.subf %27, %30 : vector<2x16x1xf32>
    %32 = math.exp %31 : vector<2x16x1xf32>
    %cst_21 = arith.constant dense<0.000000e+00> : vector<2x1xf32>
    %33 = vector.multi_reduction <add>, %32, %cst_21 [1] : vector<2x16x1xf32> to vector<2x1xf32>
    %34 = vector.shape_cast %33 : vector<2x1xf32> to vector<2x1x1xf32>
    %35 = tpu.reciprocal %34 {approx = true} : vector<2x1x1xf32> -> vector<2x1x1xf32>
    %36 = vector.broadcast %35 : vector<2x1x1xf32> to vector<2x16x1xf32>
    %37 = arith.mulf %32, %36 : vector<2x16x1xf32>
    %38 = vector.broadcast %21 : vector<2x8x1xf32> to vector<2x8x32xf32>
    %39 = arith.mulf %0, %38 : vector<2x8x32xf32>
    %cst_22 = arith.constant dense<0.000000e+00> : vector<2x32xf32>
    %40 = vector.multi_reduction <add>, %39, %cst_22 [1] : vector<2x8x32xf32> to vector<2x32xf32>
    %41 = vector.broadcast %37 : vector<2x16x1xf32> to vector<2x16x32xf32>
    %42 = arith.mulf %1, %41 : vector<2x16x32xf32>
    %cst_23 = arith.constant dense<0.000000e+00> : vector<2x32xf32>
    %43 = vector.multi_reduction <add>, %42, %cst_23 [1] : vector<2x16x32xf32> to vector<2x32xf32>
    %cst_24 = arith.constant dense<0.000000e+00> : vector<2x1xf32>
    %44 = tpu.matmul %40, %4, %cst_24 {dimension_numbers = #tpu.dot_dimension_numbers<[1], [0], [0], [1], [0, 0, 1, 1], [], []>} : vector<2x32xf32>, vector<32x1xf32>, vector<2x1xf32> -> vector<2x1xf32>
    %cst_25 = arith.constant dense<0.000000e+00> : vector<2x1xf32>
    %45 = tpu.matmul %43, %5, %cst_25 {dimension_numbers = #tpu.dot_dimension_numbers<[1], [0], [0], [1], [0, 0, 1, 1], [], []>} : vector<2x32xf32>, vector<32x1xf32>, vector<2x1xf32> -> vector<2x1xf32>
    %46 = arith.addf %44, %45 : vector<2x1xf32>
    %c0_26 = arith.constant 0 : index
    %c0_27 = arith.constant 0 : index
    %47 = vector.load %arg7[%c0_26, %c0_27] : memref<2x1xf32, #tpu.memory_space<vmem>>, vector<2x1xf32>
    tpu.vector_store %arg7[%c0_26, %c0_27], %46 {strides = array<i32>} : memref<2x1xf32, #tpu.memory_space<vmem>>, vector<2x1xf32>,
    return
  }
  func.func @transform_0(%arg0: i32) -> (i32, i32, i32) {
    %c0_i32 = arith.constant 0 : i32
    %c0_i32_0 = arith.constant 0 : i32
    %c0_i32_1 = arith.constant 0 : i32
    return %arg0, %c0_i32, %c0_i32_0 : i32, i32, i32
  }
  func.func @transform_1(%arg0: i32) -> (i32, i32, i32) {
    %c0_i32 = arith.constant 0 : i32
    %c0_i32_0 = arith.constant 0 : i32
    %c0_i32_1 = arith.constant 0 : i32
    return %arg0, %c0_i32, %c0_i32_0 : i32, i32, i32
  }
  func.func @transform_2(%arg0: i32) -> (i32, i32, i32) {
    %c0_i32 = arith.constant 0 : i32
    %c0_i32_0 = arith.constant 0 : i32
    %c0_i32_1 = arith.constant 0 : i32
    %c0_i32_2 = arith.constant 0 : i32
    return %c0_i32, %c0_i32_0, %c0_i32_1 : i32, i32, i32
  }
  func.func @transform_3(%arg0: i32) -> (i32, i32, i32) {
    %c0_i32 = arith.constant 0 : i32
    %c0_i32_0 = arith.constant 0 : i32
    %c0_i32_1 = arith.constant 0 : i32
    %c0_i32_2 = arith.constant 0 : i32
    return %c0_i32, %c0_i32_0, %c0_i32_1 : i32, i32, i32
  }
  func.func @transform_4(%arg0: i32) -> (i32, i32) {
    %c0_i32 = arith.constant 0 : i32
    %c0_i32_0 = arith.constant 0 : i32
    %c0_i32_1 = arith.constant 0 : i32
    return %c0_i32, %c0_i32_0 : i32, i32
  }
  func.func @transform_5(%arg0: i32) -> (i32, i32) {
    %c0_i32 = arith.constant 0 : i32
    %c0_i32_0 = arith.constant 0 : i32
    %c0_i32_1 = arith.constant 0 : i32
    return %c0_i32, %c0_i32_0 : i32, i32
  }
  func.func @transform_6(%arg0: i32) -> (i32, i32) {
    %c0_i32 = arith.constant 0 : i32
    %c0_i32_0 = arith.constant 0 : i32
    return %arg0, %c0_i32 : i32, i32
  }
}

</mosaic_0001>

<bundles_post_ra>
// kernel: tpu_custom_call.1
= control target key start
LH: loop header
LB: loop body
LE: loop exit
PB: predicated region body
PF: predicated region fallthrough
CT: control target
= control target key end

     0   :  { %vm47_vm0 = vcmask 261120   ;;  %v429_v20 = vmov 0.0|0.0   ;;  %vm430_vm1 = vmmov 0   ;;  %v431_v28 = vmov 0.0   ;;  %s556_s1 = inlined_call_operand.vmem [shape: f32[2,16,32], index: 1, kind: input, shape index: {}]   ;;  %s557_s3 = inlined_call_operand.vmem [shape: f32[1,1,32], index: 3, kind: input, shape index: {}]   ;;  %s558_s0 = inlined_call_operand.vmem [shape: f32[2,8,32], index: 0, kind: input, shape index: {}]   ;;  %s559_s2 = inlined_call_operand.vmem [shape: f32[1,1,32], index: 2, kind: input, shape index: {}]   ;;  %s560_s4 = inlined_call_operand.vmem [shape: f32[32,1], index: 4, kind: input, shape index: {}]   ;;  %s561_s5 = inlined_call_operand.vmem [shape: f32[32,1], index: 5, kind: input, shape index: {}]   ;;  %s562_s6 = inlined_call_operand.vmem [shape: f32[2,1], index: 6, kind: output, shape index: {}]  }
   0x1   :  { %v470_v0 = vld [vmem:[%s556_s1 + $0x10] sm:$0xff]  ;;  %v358_v1 = vld [vmem:[%s557_s3] ss:$0 sm:$0xff]  ;;  %v485_v5 = vld [vmem:[%s556_s1 + $0x18] sm:$0xff]  ;;  %399 = vmatprep.subr.bf16.mxu0 %v429_v20  ;;  %393 = vmatprep.subr.bf16.mxu1 %v429_v20  ;;  %vm202_vm2 = vcmask 1041409   ;;  %vm351_vm3 = vcmask 1024  }
   0x2   :  { %v478_v2 = vld [vmem:[%s556_s1] sm:$0xff]  ;;  %v98_v3 = vmul.f32 %v358_v1, %v470_v0  ;;  %v490_v6 = vld [vmem:[%s556_s1 + $0x8] sm:$0xff]  ;;  %v99_v7 = vmul.f32 %v358_v1, %v485_v5  ;;  %v33_v26 = vld [vmem:[%s560_s4 + $0x10] sm:$0xff]  ;;  %390 = vmatprep.mubr.msk.f32.mxu0 %vm430_vm1, %v431_v28  ;;  %379 = vmatprep.mubr.msk.f32.mxu1 %vm430_vm1, %v431_v28 }
   0x3   :  { %v96_v4 = vmul.f32 %v358_v1, %v478_v2  ;;  %v97_v8 = vmul.f32 %v358_v1, %v490_v6  ;;  %v497_v9 = vld [vmem:[%s558_s0 + $0x8] sm:$0xff]  ;;  %v357_v10 = vld [vmem:[%s559_s2] ss:$0 sm:$0xff]  ;;  %v34_v27 = vld [vmem:[%s560_s4 + $0x18] sm:$0xff] }
   0x4   :  { %v505_v11 = vld [vmem:[%s558_s0] sm:$0xff]  ;;  %v106_v12 = vsel %vm47_vm0, %v98_v3, 0.0  ;;  %v109_v14 = vsel %vm47_vm0, %v99_v7, 0.0  ;;  %v46_v16 = vmul.f32 %v357_v10, %v497_v9  ;;  %v32_v22 = vld [vmem:[%s560_s4 + $0x8] sm:$0xff]  ;;  %v37_v30 = vld [vmem:[%s561_s5 + $0x10] sm:$0xff]  ;;  %v403_v32 = vpack.c.bf16 %v34_v27, %v33_v26 }
   0x5   :  { %v100_v13 = vsel %vm47_vm0, %v96_v4, 0.0  ;;  %107 = vadd.xlane.f32.xlu1 %v106_v12  ;;  %v103_v15 = vsel %vm47_vm0, %v97_v8, 0.0  ;;  %v45_v17 = vmul.f32 %v357_v10, %v505_v11  ;;  %v31_v21 = vld [vmem:[%s560_s4] sm:$0xff]  ;;  %v36_v25 = vld [vmem:[%s561_s5 + $0x8] sm:$0xff]  ;;  %v38_v31 = vld [vmem:[%s561_s5 + $0x18] sm:$0xff] }
   0x6   :  { %101 = vadd.xlane.f32.xlu0 %v100_v13  ;;  %v51_v18 = vsel %vm47_vm0, %v46_v16, 0.0  ;;  %v35_v23 = vld [vmem:[%s561_s5] sm:$0xff]  ;;  %v400_v24 = vpack.c.bf16 %v32_v22, %v31_v21  ;;  %v397_v33 = vpack.c.bf16 %v38_v31, %v37_v30 }
   0x7   :  { %v48_v19 = vsel %vm47_vm0, %v45_v17, 0.0  ;;  %v394_v29 = vpack.c.bf16 %v36_v25, %v35_v23 }
   0x8   :  { %401 = vmatpush3.bf16.msra.mxu0 %v400_v24 }
   0x9   :  { %110 = vadd.xlane.f32.xlu1 %v109_v14  ;;  %395 = vmatpush3.bf16.msra.mxu1 %v394_v29 }
   0xa   :  { %104 = vadd.xlane.f32.xlu0 %v103_v15  ;;  %402 = vmatprep.subr.bf16.mxu0 %v429_v20 }
   0xb   :  { %396 = vmatprep.subr.bf16.mxu1 %v429_v20 }
   0xc   :  { %404 = vmatpush3.bf16.msra.mxu0 %v403_v32 }
   0xd   :  { %52 = vadd.xlane.f32.xlu1 %v51_v18  ;;  %398 = vmatpush3.bf16.msra.mxu1 %v397_v33 }
   0xe   :  { %49 = vadd.xlane.f32.xlu0 %v48_v19 }
  0x92   :  { %v108_v34 = vpop.xlane.xlu1 %107 }
  0x93   :  { %v102_v35 = vpop.xlane.xlu0 %101  ;;  %v114_v38 = vmax.f32 %v108_v34, 0.0 }
  0x94   :  { %v112_v39 = vmax.f32 %v102_v35, 0.0 }
  0x96   :  { %v111_v36 = vpop.xlane.xlu1 %110 }
  0x97   :  { %v105_v37 = vpop.xlane.xlu0 %104  ;;  %v115_v40 = vmax.f32 %v111_v36, 0.0 }
  0x98   :  { %v113_v41 = vmax.f32 %v105_v37, 0.0 }
  0x99   :  { %v123_v42 = vmax.f32 %v114_v38, %v115_v40 }
  0x9a   :  { %v116_v43 = vmax.f32 %v112_v39, %v113_v41  ;;  %v53_v44 = vpop.xlane.xlu1 %52 }
  0x9b   :  { %v50_v45 = vpop.xlane.xlu0 %49  ;;  %v124_v46 = vrot.slane %v123_v42, 4  ;;  %v55_v48 = vmax.f32 %v53_v44, 0.0 }
  0x9c   :  { %v117_v47 = vrot.slane %v116_v43, 4  ;;  %v54_v49 = vmax.f32 %v50_v45, 0.0 }
  0x9d   :  { %v125_v50 = vmax.f32 %v123_v42, %v124_v46  ;;  %v62_v52 = vrot.slane %v55_v48, 4 }
  0x9e   :  { %v118_v51 = vmax.f32 %v116_v43, %v117_v47  ;;  %v56_v53 = vrot.slane %v54_v49, 4 }
  0x9f   :  { %v126_v54 = vrot.slane %v125_v50, 2  ;;  %v63_v56 = vmax.f32 %v55_v48, %v62_v52 }
  0xa0   :  { %v119_v55 = vrot.slane %v118_v51, 2  ;;  %v57_v57 = vmax.f32 %v54_v49, %v56_v53 }
  0xa1   :  { %v127_v58 = vmax.f32 %v125_v50, %v126_v54  ;;  %v64_v60 = vrot.slane %v63_v56, 2 }
  0xa2   :  { %v120_v59 = vmax.f32 %v118_v51, %v119_v55  ;;  %v58_v61 = vrot.slane %v57_v57, 2 }
  0xa3   :  { %v128_v62 = vrot.slane %v127_v58, 1  ;;  %v65_v1 = vmax.f32 %v63_v56, %v64_v60 }
  0xa4   :  { %v121_v63 = vrot.slane %v120_v59, 1  ;;  %v59_v3 = vmax.f32 %v57_v57, %v58_v61 }
  0xa5   :  { %v129_v4 = vmax.f32 %v127_v58, %v128_v62  ;;  %v66_v8 = vrot.slane %v65_v1, 1 }
  0xa6   :  { %v122_v7 = vmax.f32 %v120_v59, %v121_v63  ;;  %v60_v10 = vrot.slane %v59_v3, 1 }
  0xa7   :  { %v132_v12 = vsub.f32 %v114_v38, %v129_v4  ;;  %v133_v13 = vsub.f32 %v115_v40, %v129_v4  ;;  %v67_v16 = vmax.f32 %v65_v1, %v66_v8 }
  0xa8   :  { %v130_v14 = vsub.f32 %v112_v39, %v122_v7  ;;  %v131_v15 = vsub.f32 %v113_v41, %v122_v7  ;;  %v61_v17 = vmax.f32 %v59_v3, %v60_v10 }
  0xa9   :  { %v138_v18 = vmul.f32 1.442695, %v132_v12  ;;  %v140_v19 = vmul.f32 1.442695, %v133_v13  ;;  %v69_v22 = vsub.f32 %v55_v48, %v67_v16 }
  0xaa   :  { %v134_v20 = vmul.f32 1.442695, %v130_v14  ;;  %v136_v21 = vmul.f32 1.442695, %v131_v15  ;;  %v68_v23 = vsub.f32 %v54_v49, %v61_v17 }
  0xab   :  { %409 = vpow2.f32 %v138_v18  ;;  %v72_v24 = vmul.f32 1.442695, %v69_v22 }
  0xac   :  { %411 = vpow2.f32 %v140_v19  ;;  %v70_v25 = vmul.f32 1.442695, %v68_v23 }
  0xad   :  { %413 = vpow2.f32 %v134_v20 }
  0xae   :  { %415 = vpow2.f32 %v136_v21 }
  0xaf   :  { %417 = vpow2.f32 %v72_v24 }
  0xb0   :  { %419 = vpow2.f32 %v70_v25 }
  0xb5   :  { %v410_v26 = vpop.eup %409 }
  0xb6   :  { %v412_v27 = vpop.eup %411 }
  0xb7   :  { %v414_v28 = vpop.eup %413  ;;  %v149_v29 = vadd.f32 %v412_v27, %v410_v26 }
  0xb8   :  { %v416_v30 = vpop.eup %415 }
  0xb9   :  { %v418_v31 = vpop.eup %417  ;;  %v150_v32 = vrot.slane %v149_v29, 4  ;;  %v142_v33 = vadd.f32 %v416_v30, %v414_v28 }
  0xba   :  { %v420_v34 = vpop.eup %419  ;;  %v80_v35 = vrot.slane %v418_v31, 4 }
  0xbb   :  { %v151_v36 = vadd.f32 %v150_v32, %v149_v29  ;;  %v143_v37 = vrot.slane %v142_v33, 4  ;;  %v74_v38 = vrot.slane %v420_v34, 4 }
  0xbc   :  { %v81_v39 = vadd.f32 %v418_v31, %v80_v35 }
  0xbd   :  { %v152_v40 = vrot.slane %v151_v36, 2  ;;  %v144_v41 = vadd.f32 %v143_v37, %v142_v33  ;;  %v75_v42 = vadd.f32 %v420_v34, %v74_v38 }
  0xbe   :  { %v82_v43 = vrot.slane %v81_v39, 2 }
  0xbf   :  { %v153_v44 = vadd.f32 %v152_v40, %v151_v36  ;;  %v145_v45 = vrot.slane %v144_v41, 2  ;;  %v76_v46 = vrot.slane %v75_v42, 2 }
  0xc0   :  { %v83_v47 = vadd.f32 %v82_v43, %v81_v39 }
  0xc1   :  { %v154_v48 = vrot.slane %v153_v44, 1  ;;  %v146_v49 = vadd.f32 %v145_v45, %v144_v41  ;;  %v77_v50 = vadd.f32 %v76_v46, %v75_v42 }
  0xc2   :  { %v84_v51 = vrot.slane %v83_v47, 1 }
  0xc3   :  { %v155_v52 = vadd.f32 %v154_v48, %v153_v44  ;;  %v147_v53 = vrot.slane %v146_v49, 1  ;;  %v78_v54 = vrot.slane %v77_v50, 1 }
  0xc4   :  { %v85_v55 = vadd.f32 %v84_v51, %v83_v47 }
  0xc5   :  { %421 = vrcp.f32 %v155_v52  ;;  %v148_v56 = vadd.f32 %v147_v53, %v146_v49  ;;  %v79_v57 = vadd.f32 %v78_v54, %v77_v50 }
  0xc6   :  { %423 = vrcp.f32 %v85_v55 }
  0xc7   :  { %425 = vrcp.f32 %v148_v56 }
  0xc8   :  { %427 = vrcp.f32 %v79_v57 }
  0xcf   :  { %v422_v58 = vpop.eup %421 }
  0xd0   :  { %v424_v59 = vpop.eup %423  ;;  %v160_v60 = vmul.f32 %v422_v58, %v410_v26  ;;  %v161_v61 = vmul.f32 %v422_v58, %v412_v27 }
  0xd1   :  { %v426_v62 = vpop.eup %425  ;;  %v89_v63 = vmul.f32 %v424_v59, %v418_v31 }
  0xd2   :  { %v428_v1 = vpop.eup %427  ;;  %v181_v3 = vmul.f32 %v161_v61, %v485_v5  ;;  %v158_v4 = vmul.f32 %v426_v62, %v414_v28  ;;  %v159_v7 = vmul.f32 %v426_v62, %v416_v30  ;;  %v180_v8 = vmul.f32 %v160_v60, %v470_v0 }
  0xd3   :  { %v88_v10 = vmul.f32 %v428_v1, %v420_v34  ;;  %v163_v12 = vmul.f32 %v89_v63, %v497_v9 }
  0xd4   :  { %v179_v13 = vmul.f32 %v159_v7, %v490_v6  ;;  %v178_v14 = vmul.f32 %v158_v4, %v478_v2  ;;  %v191_v15 = vsel %vm47_vm0, %v180_v8, 0.0  ;;  %v192_v16 = vsel %vm47_vm0, %v181_v3, 0.0 }
  0xd5   :  { %v162_v17 = vmul.f32 %v88_v10, %v505_v11  ;;  %v171_v18 = vsel %vm47_vm0, %v163_v12, 0.0  ;;  %v193_v5 = vadd.f32 %v192_v16, %v191_v15 }
  0xd6   :  { %v172_v19 = vrot.slane %v171_v18, 4  ;;  %v182_v20 = vsel %vm47_vm0, %v178_v14, 0.0  ;;  %v183_v0 = vsel %vm47_vm0, %v179_v13, 0.0 }
  0xd7   :  { %v164_v9 = vsel %vm47_vm0, %v162_v17, 0.0  ;;  %v184_v21 = vadd.f32 %v183_v0, %v182_v20  ;;  %v194_v6 = vrot.slane %v193_v5, 4 }
  0xd8   :  { %v165_v22 = vrot.slane %v164_v9, 4  ;;  %v173_v2 = vadd.f32 %v172_v19, %v171_v18 }
  0xd9   :  { %v185_v23 = vrot.slane %v184_v21, 4  ;;  %v195_v24 = vadd.f32 %v194_v6, %v193_v5 }
  0xda   :  { %v166_v25 = vadd.f32 %v165_v22, %v164_v9  ;;  %v174_v26 = vrot.slane %v173_v2, 2 }
  0xdb   :  { %v186_v27 = vadd.f32 %v185_v23, %v184_v21  ;;  %v196_v11 = vrot.slane %v195_v24, 2 }
  0xdc   :  { %v167_v28 = vrot.slane %v166_v25, 2  ;;  %v175_v29 = vadd.f32 %v174_v26, %v173_v2 }
  0xdd   :  { %v187_v30 = vrot.slane %v186_v27, 2  ;;  %v197_v31 = vadd.f32 %v196_v11, %v195_v24 }
  0xde   :  { %v168_v32 = vadd.f32 %v167_v28, %v166_v25  ;;  %v176_v33 = vrot.slane %v175_v29, 1 }
  0xdf   :  { %v188_v34 = vadd.f32 %v187_v30, %v186_v27  ;;  %v198_v35 = vrot.slane %v197_v31, 1 }
  0xe0   :  { %v169_v36 = vrot.slane %v168_v32, 1  ;;  %v177_v37 = vadd.f32 %v176_v33, %v175_v29 }
  0xe1   :  { %v189_v38 = vrot.slane %v188_v34, 1  ;;  %v199_v39 = vadd.f32 %v198_v35, %v197_v31 }
  0xe2   :  { %v170_v40 = vadd.f32 %v169_v36, %v168_v32 }
  0xe3   :  { %v190_v41 = vadd.f32 %v189_v38, %v188_v34 }
  0xe4   :  { %v278_v42 = vsel %vm202_vm2, %v177_v37, %v170_v40 }
  0xe5   :  { %391 = vmatmul.mubr.msk.f32.vlgmr.msra.gmra.mrb[0].mxu0 %vm47_vm0, %v278_v42  ;;  %v203_v43 = vsel %vm202_vm2, %v199_v39, %v190_v41 }
  0xe6   :  { %380 = vmatmul.mubr.msk.f32.vlgmr.msra.gmra.mrb[0].mxu1 %vm47_vm0, %v203_v43 }
 0x1b8   :  { %v347_v44 = vpop.f32.mrb[0].mxu0 }
 0x1b9   :  { %v392_v45 = vpop.f32.mrb[1].mxu0  ;;  %v272_v46 = vpop.f32.mrb[0].mxu1 }
 0x1ba   :  { %v348_v47 = vadd.f32 %v347_v44, %v272_v46  ;;  %v381_v48 = vpop.f32.mrb[1].mxu1 }
 0x1bc   :  { %352 = vst.msk [vmem:[%s562_s6] sm:$0x3] %vm351_vm3, %v348_v47 }

</bundles_post_ra>
